<compile_context>
chip_gen: v6e
topology: v6e:2x2x1
jax: 0.10.0
libtpu: 0.0.40
codegen_flags: <defaults>
</compile_context>

<pallas_src>
import functools

import jax
import jax.numpy as jnp
from jax.experimental import pallas as pl
from jax.experimental.pallas import tpu as pltpu

LANE = 128
MIB = 1024 * 1024


def _round_up(x, m):
    return (x + m - 1) // m * m


# ----------------------------- Pallas kernel -------------------------------

def fused_mlp_kernel(x_ref, *refs, num_layers):
    """All layers + final log_softmax fused, on one resident row tile.

    refs = (w0, b0, w1, b1, ..., w_{L-1}, b_{L-1}, o_ref)
      w_i : [Cin_i(_pad), Cout_i_pad]  folded (Wl+Wr), pre-transposed, compute dtype
      b_i : [1, Cout_i_pad]            f32; padded lanes of the LAST bias are -1e30
      o   : [tile, Cout_pad]
    Padded weight rows/cols are zero so padded lanes of every intermediate stay
    exactly zero; the -1e30 pad bias on the final layer makes padded lanes fall
    out of the softmax (exp underflows to 0) without any iota/select.
    """
    o_ref = refs[-1]
    h = x_ref[...]                                   # compute dtype (bf16 or f32)
    out = None
    for i in range(num_layers):
        w = refs[2 * i][...]
        b = refs[2 * i + 1][...]
        # single folded matmul per layer, f32 accumulation on the MXU
        out = jnp.dot(h, w, preferred_element_type=jnp.float32) + b
        if i != num_layers - 1:
            out = jnp.maximum(out, 0.0)              # ReLU on the VPU, f32
            h = out.astype(x_ref.dtype)              # back to compute dtype for MXU

    # Numerically stable log_softmax; padded lanes already carry ~-1e30.
    m = jnp.max(out, axis=-1, keepdims=True)
    s = out - m
    lse = jnp.log(jnp.sum(jnp.exp(s), axis=-1, keepdims=True))
    o_ref[...] = (s - lse).astype(o_ref.dtype)


# ----------------------------- parameters -----------------------------------

def init_mlp_params(key, in_channels, hidden_channels, out_channels, num_layers):
    """Deterministic init mimicking torch.nn.Linear.reset_parameters
    (uniform(-1/sqrt(fan_in), 1/sqrt(fan_in))). Weights stored transposed
    [in, out]; lin_r has no bias (matches SAGEConv_PeerMLP)."""
    dims = [in_channels] + [hidden_channels] * (num_layers - 1) + [out_channels]
    params = []
    for li in range(num_layers):
        cin, cout = dims[li], dims[li + 1]
        key, k1, k2, k3 = jax.random.split(key, 4)
        bound = 1.0 / jnp.sqrt(cin)
        wl_t = jax.random.uniform(k1, (cin, cout), jnp.float32, -bound, bound)
        bl = jax.random.uniform(k2, (1, cout), jnp.float32, -bound, bound)
        wr_t = jax.random.uniform(k3, (cin, cout), jnp.float32, -bound, bound)
        params.append((wl_t, bl, wr_t))
    return params


def prepare_params(params, compute_dtype):
    """Fold lin_l + lin_r (x@Wl + x@Wr == x@(Wl+Wr)), zero-pad output feature
    dims to 128-lane multiples, cast weights to the compute dtype.  Padded
    lanes of the FINAL layer's bias are set to -1e30 so they drop out of the
    in-kernel log_softmax with no explicit mask."""
    prepared = []
    prev_pad = params[0][0].shape[0]                 # layer-0 input dim, unpadded
    num_layers = len(params)
    for li, (wl_t, bl, wr_t) in enumerate(params):
        cin, cout = wl_t.shape
        cout_p = _round_up(cout, LANE)
        w = wl_t + wr_t                              # exact by linearity
        w_p = jnp.zeros((prev_pad, cout_p), jnp.float32).at[:cin, :cout].set(w)
        pad_fill = -1e30 if (li == num_layers - 1 and cout_p > cout) else 0.0
        b_p = jnp.full((1, cout_p), pad_fill, jnp.float32).at[:, :cout].set(bl)
        prepared.append((w_p.astype(compute_dtype), b_p))   # bias stays f32
        prev_pad = cout_p
    return prepared


# ----------------------------- hardware queries ------------------------------

def _vmem_capacity_bytes():
    try:
        cap = getattr(pltpu.get_tpu_info(), "vmem_capacity_bytes", None)
        if cap:
            return int(cap)
    except Exception:
        pass
    try:
        kind = jax.devices()[0].device_kind.lower()
    except Exception:
        kind = ""
    return 64 * MIB if "v7" in kind else 128 * MIB


def _mxu_m_rows():
    try:
        kind = jax.devices()[0].device_kind.lower()
    except Exception:
        kind = ""
    return 128 if "v5" in kind else 256   # 4x128^2 MXU on v5e, 2x256^2 on v6e/v7x


# ----------------------------- wrapper ---------------------------------------

def mlp_forward(x, params, *, compute_dtype=jnp.bfloat16, out_dtype=jnp.float32,
                row_tile=512, slice_output=True, single_buffer_weights=True):
    """Fused MLP forward: one pallas_call over row tiles, all weights resident."""
    n, cin = x.shape
    num_layers = len(params)
    prepared = prepare_params(params, compute_dtype)
    cout = params[-1][0].shape[1]
    cout_p = prepared[-1][0].shape[1]

    x_c = x.astype(compute_dtype)
    xb = jnp.dtype(compute_dtype).itemsize
    ob = jnp.dtype(out_dtype).itemsize

    # --- generation-aware VMEM budget ----------------------------------------
    vmem_cap = _vmem_capacity_bytes()                # 128 MiB v5e/v6e, 64 MiB v7x
    vmem_limit = int(vmem_cap * 0.85)                # ~108 MiB / ~54 MiB scoped limit
    vmem_budget = vmem_limit - 6 * MIB               # headroom for compiler internals

    wbuf = 1 if single_buffer_weights else 2         # grid-invariant -> 1 buffer
    weight_bytes = wbuf * sum(w.size * w.dtype.itemsize + b.size * b.dtype.itemsize
                              for w, b in prepared)
    # Bytes per tile row: double-buffered x + out tiles, plus every layer's f32
    # intermediate and its compute-dtype recast (conservative sum over layers).
    per_row = 2 * cin * xb + 2 * cout_p * ob
    for w, _ in prepared:
        per_row += w.shape[1] * (4 + xb)

    def fits(t):
        return weight_bytes + t * per_row <= vmem_budget

    # --- row tile: MXU-aligned, >= 2 grid steps when possible ----------------
    sub = 8 * (4 // xb)                               # 8 rows f32, 16 rows bf16
    mxu_m = _mxu_m_rows()
    align = mxu_m if n >= 2 * mxu_m else sub          # tiny N: fall back to sublane
    cap = max(align, _round_up(pl.cdiv(n, 2), align))  # >=2 steps -> v7x megacore
    tn = min(max(_round_up(max(row_tile, 1), align), align), cap)
    while tn > align and not fits(tn):
        tn = max(align, _round_up(tn // 2, align))
    # TODO(synk): if weight_bytes alone exceeds the VMEM budget (very wide
    # production layers), switch to a K-tiled / emit_pipeline variant that
    # streams weight tiles from HBM instead of shrinking the row tile.

    grid = (pl.cdiv(n, tn),)

    def _weight_spec(block_shape, single_buffer):
        if single_buffer:
            try:   # single-buffer grid-invariant operands; frees VMEM for rows
                return pl.BlockSpec(block_shape, lambda i: (0, 0),
                                    pipeline_mode=pl.Buffered(1))
            except Exception:
                pass
        return pl.BlockSpec(block_shape, lambda i: (0, 0))

    kernel = functools.partial(fused_mlp_kernel, num_layers=num_layers)

    def _run(single_buffer):
        in_specs = [pl.BlockSpec((tn, cin), lambda i: (i, 0))]
        flat_params = []
        for w, b in prepared:
            in_specs.append(_weight_spec(w.shape, single_buffer))
            in_specs.append(_weight_spec(b.shape, single_buffer))
            flat_params += [w, b]
        return pl.pallas_call(
            kernel,
            out_shape=jax.ShapeDtypeStruct((n, cout_p), out_dtype),
            grid_spec=pltpu.PrefetchScalarGridSpec(
                num_scalar_prefetch=0,
                grid=grid,
                in_specs=in_specs,
                out_specs=pl.BlockSpec((tn, cout_p), lambda i: (i, 0)),
            ),
            compiler_params=pltpu.CompilerParams(
                dimension_semantics=("parallel",),     # rows shard across TCs (v7x)
                vmem_limit_bytes=vmem_limit,
            ),
        )(x_c, *flat_params)

    if single_buffer_weights:
        try:
            out_p = _run(True)
        except Exception:
            out_p = _run(False)   # fallback if Buffered(1) is unsupported here
    else:
        out_p = _run(False)

    if slice_output:
        return out_p[:, :cout]    # drop padded logit lanes
    return out_p                  # padded (n, cout_p); lanes >= cout are ~-1e30


# ----------------------------- references (pure JAX) ------------------------

def mlp_forward_ref(x, params):
    """Original two-matmul formulation (matches the PyTorch module exactly)."""
    num_layers = len(params)
    for i, (wl_t, bl, wr_t) in enumerate(params):
        x = x @ wl_t + bl + x @ wr_t
        if i != num_layers - 1:
            x = jnp.maximum(x, 0.0)
    return jax.nn.log_softmax(x, axis=-1)


def mlp_forward_ref_folded(x, params):
    """Algebraically identical folded formulation (same structure as kernel)."""
    num_layers = len(params)
    for i, (wl_t, bl, wr_t) in enumerate(params):
        x = x @ (wl_t + wr_t) + bl
        if i != num_layers - 1:
            x = jnp.maximum(x, 0.0)
    return jax.nn.log_softmax(x, axis=-1)


# ----------------------------- main ------------------------------------------

if __name__ == "__main__":
    key = jax.random.PRNGKey(0)
    kx, kp = jax.random.split(key)

    # Small node-feature matrix: 64 nodes, 16 in features, hidden 32, 8 classes.
    N, IN_C, HID_C, OUT_C, NUM_LAYERS = 64, 16, 32, 8, 3
    x = jax.random.normal(kx, (N, IN_C), jnp.float32)
    params = init_mlp_params(kp, IN_C, HID_C, OUT_C, NUM_LAYERS)

    ref_folded = mlp_forward_ref_folded(x, params)
    ref_orig = mlp_forward_ref(x, params)

    # f32 compute path (small row_tile -> multi-step pipelined grid), tight check.
    out_f32 = jax.block_until_ready(
        mlp_forward(x, params, compute_dtype=jnp.float32, row_tile=16))
    assert out_f32.shape == (N, OUT_C), out_f32.shape
    assert jnp.allclose(out_f32, ref_folded, atol=1e-4, rtol=1e-4), \
        "kernel mismatch vs folded reference"
    # Wl+Wr folding is exact in real arithmetic; allow small fp re-association slack.
    assert jnp.allclose(out_f32, ref_orig, atol=5e-2, rtol=5e-2), \
        "kernel mismatch vs original two-matmul reference"

    # Default path: bf16 matmul inputs / f32 accumulation (MXU fast path).
    out_bf16 = jax.block_until_ready(mlp_forward(x, params))
    assert out_bf16.shape == (N, OUT_C), out_bf16.shape
    assert jnp.allclose(out_bf16.astype(jnp.float32), ref_folded,
                        atol=0.15, rtol=0.05), "bf16 kernel drifted too far"

    # Reduced-writeback variant: bf16 log-probs, padded buffer returned as-is
    # (padded lanes hold ~-1e30 and must be ignored by the consumer).
    out_pad = jax.block_until_ready(
        mlp_forward(x, params, out_dtype=jnp.bfloat16, slice_output=False))
    assert out_pad.shape == (N, _round_up(OUT_C, LANE)), out_pad.shape
    assert jnp.allclose(out_pad[:, :OUT_C].astype(jnp.float32), ref_folded,
                        atol=0.2, rtol=0.05), "bf16-output kernel drifted too far"

    print("KERNEL_OK")
</pallas_src>

<mosaic_0001>
module attributes {stable_mosaic.version = 11 : i64} {
  func.func @fused_mlp_kernel(%arg0: i32, %arg1: memref<16x16xf32, #tpu.memory_space<vmem>>, %arg2: memref<16x128xf32, #tpu.memory_space<vmem>>, %arg3: memref<1x128xf32, #tpu.memory_space<vmem>>, %arg4: memref<128x128xf32, #tpu.memory_space<vmem>>, %arg5: memref<1x128xf32, #tpu.memory_space<vmem>>, %arg6: memref<128x128xf32, #tpu.memory_space<vmem>>, %arg7: memref<1x128xf32, #tpu.memory_space<vmem>>, %arg8: memref<16x128xf32, #tpu.memory_space<vmem>>) attributes {dimension_semantics = [#tpu.dimension_semantics<parallel>], iteration_bounds = array<i64: 4>, scalar_prefetch = 0 : i64, scratch_operands = 0 : i64, tpu.core_type = #tpu.core_type<tc>, window_params = [{transform_indices = @transform_0, window_bounds = array<i64: 16, 16>}, {pipeline_mode = #tpu.pipeline_mode<synchronous>, transform_indices = @transform_1, window_bounds = array<i64: 16, 128>}, {pipeline_mode = #tpu.pipeline_mode<synchronous>, transform_indices = @transform_2, window_bounds = array<i64: 1, 128>}, {pipeline_mode = #tpu.pipeline_mode<synchronous>, transform_indices = @transform_3, window_bounds = array<i64: 128, 128>}, {pipeline_mode = #tpu.pipeline_mode<synchronous>, transform_indices = @transform_4, window_bounds = array<i64: 1, 128>}, {pipeline_mode = #tpu.pipeline_mode<synchronous>, transform_indices = @transform_5, window_bounds = array<i64: 128, 128>}, {pipeline_mode = #tpu.pipeline_mode<synchronous>, transform_indices = @transform_6, window_bounds = array<i64: 1, 128>}, {transform_indices = @transform_7, window_bounds = array<i64: 16, 128>}]} {
    %c0 = arith.constant 0 : index
    %c0_0 = arith.constant 0 : index
    %0 = vector.load %arg1[%c0, %c0_0] : memref<16x16xf32, #tpu.memory_space<vmem>>, vector<16x16xf32>
    %c0_1 = arith.constant 0 : index
    %c0_2 = arith.constant 0 : index
    %1 = vector.load %arg2[%c0_1, %c0_2] : memref<16x128xf32, #tpu.memory_space<vmem>>, vector<16x128xf32>
    %c0_3 = arith.constant 0 : index
    %c0_4 = arith.constant 0 : index
    %2 = vector.load %arg3[%c0_3, %c0_4] : memref<1x128xf32, #tpu.memory_space<vmem>>, vector<1x128xf32>
    %cst = arith.constant dense<0.000000e+00> : vector<16x128xf32>
    %3 = tpu.matmul %0, %1, %cst {dimension_numbers = #tpu.dot_dimension_numbers<[1], [0], [0], [1], [0, 0, 1, 1], [], []>} : vector<16x16xf32>, vector<16x128xf32>, vector<16x128xf32> -> vector<16x128xf32>
    %4 = vector.broadcast %2 : vector<1x128xf32> to vector<16x128xf32>
    %5 = arith.addf %3, %4 : vector<16x128xf32>
    %cst_5 = arith.constant 0.000000e+00 : f32
    %6 = vector.broadcast %cst_5 : f32 to vector<16x128xf32>
    %7 = arith.maximumf %5, %6 : vector<16x128xf32>
    %c0_6 = arith.constant 0 : index
    %c0_7 = arith.constant 0 : index
    %8 = vector.load %arg4[%c0_6, %c0_7] : memref<128x128xf32, #tpu.memory_space<vmem>>, vector<128x128xf32>
    %c0_8 = arith.constant 0 : index
    %c0_9 = arith.constant 0 : index
    %9 = vector.load %arg5[%c0_8, %c0_9] : memref<1x128xf32, #tpu.memory_space<vmem>>, vector<1x128xf32>
    %cst_10 = arith.constant dense<0.000000e+00> : vector<16x128xf32>
    %10 = tpu.matmul %7, %8, %cst_10 {dimension_numbers = #tpu.dot_dimension_numbers<[1], [0], [0], [1], [0, 0, 1, 1], [], []>} : vector<16x128xf32>, vector<128x128xf32>, vector<16x128xf32> -> vector<16x128xf32>
    %11 = vector.broadcast %9 : vector<1x128xf32> to vector<16x128xf32>
    %12 = arith.addf %10, %11 : vector<16x128xf32>
    %cst_11 = arith.constant 0.000000e+00 : f32
    %13 = vector.broadcast %cst_11 : f32 to vector<16x128xf32>
    %14 = arith.maximumf %12, %13 : vector<16x128xf32>
    %c0_12 = arith.constant 0 : index
    %c0_13 = arith.constant 0 : index
    %15 = vector.load %arg6[%c0_12, %c0_13] : memref<128x128xf32, #tpu.memory_space<vmem>>, vector<128x128xf32>
    %c0_14 = arith.constant 0 : index
    %c0_15 = arith.constant 0 : index
    %16 = vector.load %arg7[%c0_14, %c0_15] : memref<1x128xf32, #tpu.memory_space<vmem>>, vector<1x128xf32>
    %cst_16 = arith.constant dense<0.000000e+00> : vector<16x128xf32>
    %17 = tpu.matmul %14, %15, %cst_16 {dimension_numbers = #tpu.dot_dimension_numbers<[1], [0], [0], [1], [0, 0, 1, 1], [], []>} : vector<16x128xf32>, vector<128x128xf32>, vector<16x128xf32> -> vector<16x128xf32>
    %18 = vector.broadcast %16 : vector<1x128xf32> to vector<16x128xf32>
    %19 = arith.addf %17, %18 : vector<16x128xf32>
    %cst_17 = arith.constant dense<0xFF800000> : vector<16xf32>
    %20 = vector.multi_reduction <maximumf>, %19, %cst_17 [1] : vector<16x128xf32> to vector<16xf32>
    %21 = vector.shape_cast %20 : vector<16xf32> to vector<16x1xf32>
    %22 = vector.broadcast %21 : vector<16x1xf32> to vector<16x128xf32>
    %23 = arith.subf %19, %22 : vector<16x128xf32>
    %24 = math.exp %23 : vector<16x128xf32>
    %cst_18 = arith.constant dense<0.000000e+00> : vector<16xf32>
    %25 = vector.multi_reduction <add>, %24, %cst_18 [1] : vector<16x128xf32> to vector<16xf32>
    %26 = vector.shape_cast %25 : vector<16xf32> to vector<16x1xf32>
    %27 = math.log %26 : vector<16x1xf32>
    %28 = vector.broadcast %27 : vector<16x1xf32> to vector<16x128xf32>
    %29 = arith.subf %23, %28 : vector<16x128xf32>
    %c0_19 = arith.constant 0 : index
    %c0_20 = arith.constant 0 : index
    %30 = vector.load %arg8[%c0_19, %c0_20] : memref<16x128xf32, #tpu.memory_space<vmem>>, vector<16x128xf32>
    tpu.vector_store %arg8[%c0_19, %c0_20], %29 {strides = array<i32>} : memref<16x128xf32, #tpu.memory_space<vmem>>, vector<16x128xf32>,
    return
  }
  func.func @transform_0(%arg0: i32) -> (i32, i32) {
    %c0_i32 = arith.constant 0 : i32
    %c0_i32_0 = arith.constant 0 : i32
    return %arg0, %c0_i32 : i32, i32
  }
  func.func @transform_1(%arg0: i32) -> (i32, i32) {
    %c0_i32 = arith.constant 0 : i32
    %c0_i32_0 = arith.constant 0 : i32
    %c0_i32_1 = arith.constant 0 : i32
    return %c0_i32, %c0_i32_0 : i32, i32
  }
  func.func @transform_2(%arg0: i32) -> (i32, i32) {
    %c0_i32 = arith.constant 0 : i32
    %c0_i32_0 = arith.constant 0 : i32
    %c0_i32_1 = arith.constant 0 : i32
    return %c0_i32, %c0_i32_0 : i32, i32
  }
  func.func @transform_3(%arg0: i32) -> (i32, i32) {
    %c0_i32 = arith.constant 0 : i32
    %c0_i32_0 = arith.constant 0 : i32
    %c0_i32_1 = arith.constant 0 : i32
    return %c0_i32, %c0_i32_0 : i32, i32
  }
  func.func @transform_4(%arg0: i32) -> (i32, i32) {
    %c0_i32 = arith.constant 0 : i32
    %c0_i32_0 = arith.constant 0 : i32
    %c0_i32_1 = arith.constant 0 : i32
    return %c0_i32, %c0_i32_0 : i32, i32
  }
  func.func @transform_5(%arg0: i32) -> (i32, i32) {
    %c0_i32 = arith.constant 0 : i32
    %c0_i32_0 = arith.constant 0 : i32
    %c0_i32_1 = arith.constant 0 : i32
    return %c0_i32, %c0_i32_0 : i32, i32
  }
  func.func @transform_6(%arg0: i32) -> (i32, i32) {
    %c0_i32 = arith.constant 0 : i32
    %c0_i32_0 = arith.constant 0 : i32
    %c0_i32_1 = arith.constant 0 : i32
    return %c0_i32, %c0_i32_0 : i32, i32
  }
  func.func @transform_7(%arg0: i32) -> (i32, i32) {
    %c0_i32 = arith.constant 0 : i32
    %c0_i32_0 = arith.constant 0 : i32
    return %arg0, %c0_i32 : i32, i32
  }
}

module attributes {stable_mosaic.version = 11 : i64} {
  func.func @fused_mlp_kernel(%arg0: i32, %arg1: memref<16x16xf32, #tpu.memory_space<vmem>>, %arg2: memref<16x128xf32, #tpu.memory_space<vmem>>, %arg3: memref<1x128xf32, #tpu.memory_space<vmem>>, %arg4: memref<128x128xf32, #tpu.memory_space<vmem>>, %arg5: memref<1x128xf32, #tpu.memory_space<vmem>>, %arg6: memref<128x128xf32, #tpu.memory_space<vmem>>, %arg7: memref<1x128xf32, #tpu.memory_space<vmem>>, %arg8: memref<16x128xf32, #tpu.memory_space<vmem>>) attributes {dimension_semantics = [#tpu.dimension_semantics<parallel>], iteration_bounds = array<i64: 4>, scalar_prefetch = 0 : i64, scratch_operands = 0 : i64, tpu.core_type = #tpu.core_type<tc>, window_params = [{transform_indices = @transform_0, window_bounds = array<i64: 16, 16>}, {pipeline_mode = #tpu.pipeline_mode<synchronous>, transform_indices = @transform_1, window_bounds = array<i64: 16, 128>}, {pipeline_mode = #tpu.pipeline_mode<synchronous>, transform_indices = @transform_2, window_bounds = array<i64: 1, 128>}, {pipeline_mode = #tpu.pipeline_mode<synchronous>, transform_indices = @transform_3, window_bounds = array<i64: 128, 128>}, {pipeline_mode = #tpu.pipeline_mode<synchronous>, transform_indices = @transform_4, window_bounds = array<i64: 1, 128>}, {pipeline_mode = #tpu.pipeline_mode<synchronous>, transform_indices = @transform_5, window_bounds = array<i64: 128, 128>}, {pipeline_mode = #tpu.pipeline_mode<synchronous>, transform_indices = @transform_6, window_bounds = array<i64: 1, 128>}, {transform_indices = @transform_7, window_bounds = array<i64: 16, 128>}]} {
    %c0 = arith.constant 0 : index
    %c0_0 = arith.constant 0 : index
    %0 = vector.load %arg1[%c0, %c0_0] : memref<16x16xf32, #tpu.memory_space<vmem>>, vector<16x16xf32>
    %c0_1 = arith.constant 0 : index
    %c0_2 = arith.constant 0 : index
    %1 = vector.load %arg2[%c0_1, %c0_2] : memref<16x128xf32, #tpu.memory_space<vmem>>, vector<16x128xf32>
    %c0_3 = arith.constant 0 : index
    %c0_4 = arith.constant 0 : index
    %2 = vector.load %arg3[%c0_3, %c0_4] : memref<1x128xf32, #tpu.memory_space<vmem>>, vector<1x128xf32>
    %cst = arith.constant dense<0.000000e+00> : vector<16x128xf32>
    %3 = tpu.matmul %0, %1, %cst {dimension_numbers = #tpu.dot_dimension_numbers<[1], [0], [0], [1], [0, 0, 1, 1], [], []>} : vector<16x16xf32>, vector<16x128xf32>, vector<16x128xf32> -> vector<16x128xf32>
    %4 = vector.broadcast %2 : vector<1x128xf32> to vector<16x128xf32>
    %5 = arith.addf %3, %4 : vector<16x128xf32>
    %cst_5 = arith.constant 0.000000e+00 : f32
    %6 = vector.broadcast %cst_5 : f32 to vector<16x128xf32>
    %7 = arith.maximumf %5, %6 : vector<16x128xf32>
    %c0_6 = arith.constant 0 : index
    %c0_7 = arith.constant 0 : index
    %8 = vector.load %arg4[%c0_6, %c0_7] : memref<128x128xf32, #tpu.memory_space<vmem>>, vector<128x128xf32>
    %c0_8 = arith.constant 0 : index
    %c0_9 = arith.constant 0 : index
    %9 = vector.load %arg5[%c0_8, %c0_9] : memref<1x128xf32, #tpu.memory_space<vmem>>, vector<1x128xf32>
    %cst_10 = arith.constant dense<0.000000e+00> : vector<16x128xf32>
    %10 = tpu.matmul %7, %8, %cst_10 {dimension_numbers = #tpu.dot_dimension_numbers<[1], [0], [0], [1], [0, 0, 1, 1], [], []>} : vector<16x128xf32>, vector<128x128xf32>, vector<16x128xf32> -> vector<16x128xf32>
    %11 = vector.broadcast %9 : vector<1x128xf32> to vector<16x128xf32>
    %12 = arith.addf %10, %11 : vector<16x128xf32>
    %cst_11 = arith.constant 0.000000e+00 : f32
    %13 = vector.broadcast %cst_11 : f32 to vector<16x128xf32>
    %14 = arith.maximumf %12, %13 : vector<16x128xf32>
    %c0_12 = arith.constant 0 : index
    %c0_13 = arith.constant 0 : index
    %15 = vector.load %arg6[%c0_12, %c0_13] : memref<128x128xf32, #tpu.memory_space<vmem>>, vector<128x128xf32>
    %c0_14 = arith.constant 0 : index
    %c0_15 = arith.constant 0 : index
    %16 = vector.load %arg7[%c0_14, %c0_15] : memref<1x128xf32, #tpu.memory_space<vmem>>, vector<1x128xf32>
    %cst_16 = arith.constant dense<0.000000e+00> : vector<16x128xf32>
    %17 = tpu.matmul %14, %15, %cst_16 {dimension_numbers = #tpu.dot_dimension_numbers<[1], [0], [0], [1], [0, 0, 1, 1], [], []>} : vector<16x128xf32>, vector<128x128xf32>, vector<16x128xf32> -> vector<16x128xf32>
    %18 = vector.broadcast %16 : vector<1x128xf32> to vector<16x128xf32>
    %19 = arith.addf %17, %18 : vector<16x128xf32>
    %cst_17 = arith.constant dense<0xFF800000> : vector<16xf32>
    %20 = vector.multi_reduction <maximumf>, %19, %cst_17 [1] : vector<16x128xf32> to vector<16xf32>
    %21 = vector.shape_cast %20 : vector<16xf32> to vector<16x1xf32>
    %22 = vector.broadcast %21 : vector<16x1xf32> to vector<16x128xf32>
    %23 = arith.subf %19, %22 : vector<16x128xf32>
    %24 = math.exp %23 : vector<16x128xf32>
    %cst_18 = arith.constant dense<0.000000e+00> : vector<16xf32>
    %25 = vector.multi_reduction <add>, %24, %cst_18 [1] : vector<16x128xf32> to vector<16xf32>
    %26 = vector.shape_cast %25 : vector<16xf32> to vector<16x1xf32>
    %27 = math.log %26 : vector<16x1xf32>
    %28 = vector.broadcast %27 : vector<16x1xf32> to vector<16x128xf32>
    %29 = arith.subf %23, %28 : vector<16x128xf32>
    %c0_19 = arith.constant 0 : index
    %c0_20 = arith.constant 0 : index
    %30 = vector.load %arg8[%c0_19, %c0_20] : memref<16x128xf32, #tpu.memory_space<vmem>>, vector<16x128xf32>
    tpu.vector_store %arg8[%c0_19, %c0_20], %29 {strides = array<i32>} : memref<16x128xf32, #tpu.memory_space<vmem>>, vector<16x128xf32>,
    return
  }
  func.func @transform_0(%arg0: i32) -> (i32, i32) {
    %c0_i32 = arith.constant 0 : i32
    %c0_i32_0 = arith.constant 0 : i32
    return %arg0, %c0_i32 : i32, i32
  }
  func.func @transform_1(%arg0: i32) -> (i32, i32) {
    %c0_i32 = arith.constant 0 : i32
    %c0_i32_0 = arith.constant 0 : i32
    %c0_i32_1 = arith.constant 0 : i32
    return %c0_i32, %c0_i32_0 : i32, i32
  }
  func.func @transform_2(%arg0: i32) -> (i32, i32) {
    %c0_i32 = arith.constant 0 : i32
    %c0_i32_0 = arith.constant 0 : i32
    %c0_i32_1 = arith.constant 0 : i32
    return %c0_i32, %c0_i32_0 : i32, i32
  }
  func.func @transform_3(%arg0: i32) -> (i32, i32) {
    %c0_i32 = arith.constant 0 : i32
    %c0_i32_0 = arith.constant 0 : i32
    %c0_i32_1 = arith.constant 0 : i32
    return %c0_i32, %c0_i32_0 : i32, i32
  }
  func.func @transform_4(%arg0: i32) -> (i32, i32) {
    %c0_i32 = arith.constant 0 : i32
    %c0_i32_0 = arith.constant 0 : i32
    %c0_i32_1 = arith.constant 0 : i32
    return %c0_i32, %c0_i32_0 : i32, i32
  }
  func.func @transform_5(%arg0: i32) -> (i32, i32) {
    %c0_i32 = arith.constant 0 : i32
    %c0_i32_0 = arith.constant 0 : i32
    %c0_i32_1 = arith.constant 0 : i32
    return %c0_i32, %c0_i32_0 : i32, i32
  }
  func.func @transform_6(%arg0: i32) -> (i32, i32) {
    %c0_i32 = arith.constant 0 : i32
    %c0_i32_0 = arith.constant 0 : i32
    %c0_i32_1 = arith.constant 0 : i32
    return %c0_i32, %c0_i32_0 : i32, i32
  }
  func.func @transform_7(%arg0: i32) -> (i32, i32) {
    %c0_i32 = arith.constant 0 : i32
    %c0_i32_0 = arith.constant 0 : i32
    return %arg0, %c0_i32 : i32, i32
  }
}

</mosaic_0001>

<bundles_post_ra>
// kernel: tpu_custom_call.1
= control target key start
LH: loop header
LB: loop body
LE: loop exit
PB: predicated region body
PF: predicated region fallthrough
CT: control target
= control target key end

     0   :  { %12 = vsyncpa [#allocation3], 0  ;;  %s1262_s0 = inlined_call_operand.vmem [shape: f32[64,16], index: 0, kind: input, shape index: {}]   ;;  %s1263_s1 = inlined_call_operand.vmem [shape: f32[16,128], index: 1, kind: input, shape index: {}]   ;;  %s1264_s2 = inlined_call_operand.vmem [shape: f32[1,128], index: 2, kind: input, shape index: {}]   ;;  %s1265_s3 = inlined_call_operand.hbm [shape: f32[128,128], index: 3, kind: input, shape index: {}]   ;;  %s1266_s4 = inlined_call_operand.vmem [shape: f32[1,128], index: 4, kind: input, shape index: {}]   ;;  %s1267_s5 = inlined_call_operand.hbm [shape: f32[128,128], index: 5, kind: input, shape index: {}]   ;;  %s1268_s6 = inlined_call_operand.vmem [shape: f32[1,128], index: 6, kind: input, shape index: {}]   ;;  %s1269_s7 = inlined_call_operand.hbm [shape: f32[64,128], index: 7, kind: output, shape index: {}]  }
   0x1   :  { %13 = vsyncpa [#allocation6], 0 }
   0x2   :  { %14 = vsyncpa [#allocation4], 0 }
   0x3   :  { %16 = vsyncpa [#allocation4 + $0x1], 0  ;;  %s1103_s24 = smov 0   ;;  %s1105_s25 = smov 0  }
   0x4   :  { %s1107_s26 = smov 0   ;;  %s1109_s27 = smov 0  }
   0x5 LB: > { %s1124_s28 = sadd.s32 4294967295, %s1054_s27   ;;  %s723_s29 = sadd.s32 4294967294, %s1054_s27   ;;  %s1054_s27 = sphi %s1109_s27, %s1283_s27   ;;  %s1050_s26 = sphi %s1107_s26, %s1282_s26   ;;  %s1046_s25 = sphi %s1105_s25, %s1281_s25   ;;  %s1042_s24 = sphi %s1103_s24, %s1280_s24  }
   0x6   : > { %s1128_s30 = sadd.s32 1, %s1054_s27   ;;  %s181_s8 = sadd.s32 1, %s1050_s26 }
   0x7   : > { %s178_s9 = ssub.s32 %s1054_s27, %s1128_s30  ;;  %p191_p0 = scmp.ne.s32.totalorder %s1050_s26, %s1046_s25 }
   0x8   : > { %p179_p1 = scmp.eq.s32.totalorder %s178_s9, 0  ;;  %p192_p2 = scmp.eq.s32.totalorder %s1124_s28, 3 }
   0x9   : > { %p197_p3 = scmp.ne.s32.totalorder %s1046_s25, %s1042_s24  ;;  %p198_p4 = scmp.eq.s32.totalorder %s723_s29, 3 }
   0xa   : > { %s1139_s10 = scalar_select %p179_p1, %s1050_s26, %s181_s8  }
   0xb   : > { %p1141_p5 = por %p192_p2, %p191_p0  ;;  %p1145_p6 = por %p198_p4, %p197_p3 }
   0xc   : > { %p724_p7 = scmp.ge.s32.totalorder %s1054_s27, 1  ;;  %p205_p8 = scmp.lt.s32.totalorder %s1054_s27, 5 }
   0xd   : > { %s1272_s12 = scalar_select %p1145_p6, 1, 0 }
   0xe   : > { %p1270_p9 = scmp.eq.s32.totalorder %s1124_s28, 0  ;;  %p1152_p10 = pnand %p724_p7, %p205_p8 }
   0xf   : > { %s1056_s14 = smov [#allocation2]   ;;  %s1057_s17 = smov [#allocation5]  }
  0x10   : > { %s223_s15 = sshll.u32 %s1056_s14, 4  ;;  %p872_p11 = pneg %p1152_p10  ;;  %s224_s15 = int_to_ptr.vmem [resolvable:$true] %s223_s15 }
  0x11   : > { %s239_s18 = sshll.u32 %s1057_s17, 4  ;;  %s945_s19 = scalar_lea.vmem %s224_s15, 2048  ;;  %s240_s18 = int_to_ptr.vmem [resolvable:$true] %s239_s18 }
  0x12   : > { %p1160_p12 = pnand %p1270_p9, %p872_p11  ;;  %p946_p0 = scmp.ne.s32.totalorder %s224_s15, %s945_s19 }
  0x13   : > { %p953_p3 = scmp.lt.s32.totalorder %s224_s15, %s224_s15  ;;  %p954_p4 = scmp.lt.s32.totalorder %s945_s19, %s945_s19 }
  0x14   : > { %p936_p13 = pneg %p1160_p12 }
  0x15   : > { %p955_p7 = por %p954_p4, %p953_p3 }
  0x16   : > { %p948_p1 = pnand %p946_p0, %p936_p13 }
  0x18   : > { %p949_p2 = pneg %p948_p1 }
  0x1a   : > { %p956_p8 = pnand %p955_p7, %p949_p2 }
  0x1c   : > { %959 = shalt.err (!%p956_p8)
}
  0x1d   : > { %s1058_s20 = smov 128   ;;  %s1059_s21 = smov 8  }
  0x1e   : > { %875 = dma.hbm_to_vmem [thread:$0]  (!%p1160_p12), %s1265_s3, 2048, %s224_s15, [#allocation3], %s1058_s20, %s1058_s20, %s1059_s21  }
  0x1f   : > { %s971_s29 = scalar_lea.vmem %s240_s18, 2048  ;;  %p979_p9 = scmp.lt.s32.totalorder %s240_s18, %s240_s18 }
  0x20   : > { %p972_p11 = scmp.ne.s32.totalorder %s240_s18, %s971_s29  ;;  %p980_p6 = scmp.lt.s32.totalorder %s971_s29, %s971_s29 }
  0x22   : > { %p974_p0 = pnand %p972_p11, %p936_p13  ;;  %p981_p3 = por %p980_p6, %p979_p9 }
  0x24   : > { %p975_p1 = pneg %p974_p0 }
  0x26   : > { %p982_p2 = pnand %p981_p3, %p975_p1 }
  0x28   : > { %985 = shalt.err (!%p982_p2)
}
  0x29   : > { %878 = dma.hbm_to_vmem [thread:$0]  (!%p1160_p12), %s1267_s5, 2048, %s240_s18, [#allocation6], %s1058_s20, %s1058_s20, %s1059_s21  }
  0x2a   : > { %267 = sbr.rel (%p1152_p10) target bundleno = 986 (0x3da), region = 48  ;;  %p1275_p4 = scmp.eq.s32.totalorder (!%p1152_p10), %s1124_s28, 0 }
  0x2f   : > { %1029 = dma.done.wait (%p1275_p4), [#allocation3], 2048   ;;  %p1276_p13 = pmov %p1275_p4 }
  0x30   : > { %p1277_p7 = pmov %p1275_p4 }
  0x31   : > { %1031 = vsyncadd (%p1276_p13), [#allocation3], 4294965248 }
  0x32   : > { %1033 = dma.done.wait (%p1277_p7), [#allocation6], 2048   ;;  %p1278_p6 = pmov %p1275_p4 }
  0x33   : > { %s732_s14 = sshll.u32 %s1124_s28, 1  ;;  %vm321_vm0 = vcmask 130048   ;;  %v313_v0 = vld [vmem:[%s1263_s1 + $0x8] sm:$0xff]  ;;  %v312_v1 = vld [vmem:[%s1263_s1] sm:$0xff]  ;;  %v420_v3 = vld [vmem:[#allocation2 + $0x78] sm:$0xff]  ;;  %s744_s18 = sshll.u32 %s1124_s28, 8 }
  0x34   : > { %1035 = vsyncadd (%p1278_p6), [#allocation6], 4294965248  ;;  %p304_p9 = scmp.lt.s32.totalorder %s732_s14, 7  ;;  %785 = vmatprep.subr.mxu0 %v313_v0  ;;  %v419_v4 = vld [vmem:[#allocation2 + $0x70] sm:$0xff]  ;;  %792 = vmatprep.subr.mxu1 %v420_v3  ;;  %v418_v6 = vld [vmem:[#allocation2 + $0x68] sm:$0xff]  ;;  %s1220_s21 = scalar_lea.hbm %s1269_s7, %s744_s18 }
  0x35   : > { %786 = vmatpush3.msra.mxu0 %v313_v0  ;;  %793 = vmatpush3.msra.mxu1 %v420_v3  ;;  %v417_v7 = vld [vmem:[#allocation2 + $0x60] sm:$0xff]  ;;  %v416_v8 = vld [vmem:[#allocation2 + $0x58] sm:$0xff]  ;;  %v415_v9 = vld [vmem:[#allocation2 + $0x50] sm:$0xff]  ;;  %s1060_s28 = smov [#allocation7]  }
  0x36   : > { %s1285_s14 = smov (!%p304_p9, %s732_s14), 7  ;;  %787 = vmatprep.subr.mxu0 %v312_v1  ;;  %794 = vmatprep.subr.mxu1 %v419_v4  ;;  %v414_v10 = vld [vmem:[#allocation2 + $0x48] sm:$0xff]  ;;  %v413_v11 = vld [vmem:[#allocation2 + $0x40] sm:$0xff]  ;;  %v412_v12 = vld [vmem:[#allocation2 + $0x38] sm:$0xff]  ;;  %s990_s29 = sshll.u32 %s1060_s28, 4  ;;  %s991_s29 = int_to_ptr.vmem [resolvable:$false] %s990_s29 }
  0x37   : > { %s733_s15 = sshll.u32 %s1285_s14, 3  ;;  %788 = vmatpush3.msra.mxu0 %v312_v1  ;;  %795 = vmatpush3.msra.mxu1 %v419_v4  ;;  %v411_v13 = vld [vmem:[#allocation2 + $0x30] sm:$0xff]  ;;  %v410_v14 = vld [vmem:[#allocation2 + $0x28] sm:$0xff]  ;;  %v409_v15 = vld [vmem:[#allocation2 + $0x20] sm:$0xff]  ;;  %s992_s8 = scalar_lea.vmem %s991_s29, 512 }
  0x38   : > { %s307_s17 = scalar_lea.vmem %s1262_s0, %s733_s15  ;;  %796 = vmatprep.subr.mxu1 %v418_v6  ;;  %v408_v16 = vld [vmem:[#allocation2 + $0x18] sm:$0xff]  ;;  %v407_v17 = vld [vmem:[#allocation2 + $0x10] sm:$0xff]  ;;  %v406_v18 = vld [vmem:[#allocation2 + $0x8] sm:$0xff]  ;;  %s300_s15 = sand.u32 1, %s1046_s25  }
  0x39   : > { %v310_v2 = vld [vmem:[%s307_s17] sm:$0xff]  ;;  %v311_v5 = vld [vmem:[%s307_s17 + $0x8] sm:$0xff]  ;;  %797 = vmatpush3.msra.mxu1 %v418_v6  ;;  %v520_v20 = vld [vmem:[#allocation5 + $0x78] sm:$0xff]  ;;  %s731_s13 = sshll.u32 %s300_s15, 4  ;;  %s1222_s22 = scalar_lea.sflag [#allocation4], %s300_s15 }
  0x3a   : > { %789 = vmatprep.mubr.msk.f32.mxu0 %vm321_vm0, %v310_v2  ;;  %798 = vmatprep.subr.mxu1 %v417_v7  ;;  %v405_v19 = vld [vmem:[#allocation2] sm:$0xff]  ;;  %v519_v21 = vld [vmem:[#allocation5 + $0x70] sm:$0xff]  ;;  %v518_v22 = vld [vmem:[#allocation5 + $0x68] sm:$0xff]  ;;  %s302_s16 = scalar_lea.vmem [#allocation7], %s731_s13 }
  0x3b   : > { %790 = vmatmul.mubr.msk.f32.vlgmr.msra.gmra.mxu0 %vm321_vm0, %v311_v5  ;;  %799 = vmatpush3.msra.mxu1 %v417_v7  ;;  %v517_v23 = vld [vmem:[#allocation5 + $0x60] sm:$0xff]  ;;  %v516_v24 = vld [vmem:[#allocation5 + $0x58] sm:$0xff]  ;;  %v515_v25 = vld [vmem:[#allocation5 + $0x50] sm:$0xff]  ;;  %s639_s17 = sshll.u32 %s302_s16, 4  ;;  %s1215_s17 = int_to_ptr.vmem [resolvable:$true] %s639_s17 }
  0x3c   : > { %800 = vmatprep.subr.mxu1 %v416_v8  ;;  %827 = vmatprep.subr.mxu0 %v520_v20  ;;  %v514_v26 = vld [vmem:[#allocation5 + $0x48] sm:$0xff]  ;;  %v513_v27 = vld [vmem:[#allocation5 + $0x40] sm:$0xff]  ;;  %v512_v28 = vld [vmem:[#allocation5 + $0x38] sm:$0xff]  ;;  %s986_s23 = scalar_lea.vmem %s1215_s17, 256  ;;  %p993_p11 = scmp.lt.s32.totalorder %s1215_s17, %s991_s29 }
  0x3d   : > { %801 = vmatpush3.msra.mxu1 %v416_v8  ;;  %828 = vmatpush3.msra.mxu0 %v520_v20  ;;  %v511_v29 = vld [vmem:[#allocation5 + $0x30] sm:$0xff]  ;;  %v510_v30 = vld [vmem:[#allocation5 + $0x28] sm:$0xff]  ;;  %v509_v31 = vld [vmem:[#allocation5 + $0x20] sm:$0xff]  ;;  %p987_p10 = scmp.ne.s32.totalorder %s1215_s17, %s986_s23  ;;  %p994_p0 = scmp.lt.s32.totalorder %s992_s8, %s986_s23 }
  0x3e   : > { %802 = vmatprep.subr.mxu1 %v415_v9  ;;  %829 = vmatprep.subr.mxu0 %v519_v21  ;;  %v734_v32 = vld [vmem:[%s1264_s2] ss:$0 sm:$0xff]  ;;  %v508_v39 = vld [vmem:[#allocation5 + $0x18] sm:$0xff]  ;;  %v507_v40 = vld [vmem:[#allocation5 + $0x10] sm:$0xff] }
  0x3f   : > { %803 = vmatpush3.msra.mxu1 %v415_v9  ;;  %830 = vmatpush3.msra.mxu0 %v519_v21  ;;  %v506_v41 = vld [vmem:[#allocation5 + $0x8] sm:$0xff]  ;;  %v505_v42 = vld [vmem:[#allocation5] sm:$0xff]  ;;  %p988_p12 = pnand %p987_p10, %p1141_p5  ;;  %p995_p1 = por %p994_p0, %p993_p11 }
  0x40   : > { %804 = vmatprep.subr.mxu1 %v414_v10  ;;  %831 = vmatprep.subr.mxu0 %v518_v22  ;;  %v737_v43 = vld [vmem:[%s1266_s4] ss:$0 sm:$0xff] }
  0x41   : > { %805 = vmatpush3.msra.mxu1 %v414_v10  ;;  %832 = vmatpush3.msra.mxu0 %v518_v22  ;;  %v738_v51 = vld [vmem:[%s1268_s6] ss:$0 sm:$0xff]  ;;  %p989_p8 = pneg %p988_p12 }
  0x42   : > { %806 = vmatprep.subr.mxu1 %v413_v11  ;;  %833 = vmatprep.subr.mxu0 %v517_v23 }
  0x43   : > { %807 = vmatpush3.msra.mxu1 %v413_v11  ;;  %834 = vmatpush3.msra.mxu0 %v517_v23  ;;  %p996_p3 = pnand %p995_p1, %p989_p8 }
  0x44   : > { %808 = vmatprep.subr.mxu1 %v412_v12  ;;  %835 = vmatprep.subr.mxu0 %v516_v24 }
  0x45   : > { %809 = vmatpush3.msra.mxu1 %v412_v12  ;;  %836 = vmatpush3.msra.mxu0 %v516_v24 }
  0x46   : > { %810 = vmatprep.subr.mxu1 %v411_v13  ;;  %837 = vmatprep.subr.mxu0 %v515_v25 }
  0x47   : > { %811 = vmatpush3.msra.mxu1 %v411_v13  ;;  %838 = vmatpush3.msra.mxu0 %v515_v25 }
  0x48   : > { %812 = vmatprep.subr.mxu1 %v410_v14  ;;  %839 = vmatprep.subr.mxu0 %v514_v26 }
  0x49   : > { %813 = vmatpush3.msra.mxu1 %v410_v14  ;;  %840 = vmatpush3.msra.mxu0 %v514_v26 }
  0x4a   : > { %814 = vmatprep.subr.mxu1 %v409_v15  ;;  %841 = vmatprep.subr.mxu0 %v513_v27 }
  0x4b   : > { %815 = vmatpush3.msra.mxu1 %v409_v15  ;;  %842 = vmatpush3.msra.mxu0 %v513_v27 }
  0x4c   : > { %816 = vmatprep.subr.mxu1 %v408_v16  ;;  %843 = vmatprep.subr.mxu0 %v512_v28 }
  0x4d   : > { %817 = vmatpush3.msra.mxu1 %v408_v16  ;;  %844 = vmatpush3.msra.mxu0 %v512_v28 }
  0x4e   : > { %818 = vmatprep.subr.mxu1 %v407_v17  ;;  %845 = vmatprep.subr.mxu0 %v511_v29 }
  0x4f   : > { %819 = vmatpush3.msra.mxu1 %v407_v17  ;;  %846 = vmatpush3.msra.mxu0 %v511_v29 }
  0x50   : > { %820 = vmatprep.subr.mxu1 %v406_v18  ;;  %847 = vmatprep.subr.mxu0 %v510_v30 }
  0x51   : > { %821 = vmatpush3.msra.mxu1 %v406_v18  ;;  %848 = vmatpush3.msra.mxu0 %v510_v30 }
  0x52   : > { %822 = vmatprep.subr.mxu1 %v405_v19  ;;  %849 = vmatprep.subr.mxu0 %v509_v31 }
  0x53   : > { %823 = vmatpush3.msra.mxu1 %v405_v19  ;;  %850 = vmatpush3.msra.mxu0 %v509_v31 }
  0x54   : > { %851 = vmatprep.subr.mxu0 %v508_v39 }
  0x55   : > { %852 = vmatpush3.msra.mxu0 %v508_v39 }
  0x56   : > { %853 = vmatprep.subr.mxu0 %v507_v40 }
  0x57   : > { %854 = vmatpush3.msra.mxu0 %v507_v40 }
  0x58   : > { %855 = vmatprep.subr.mxu0 %v506_v41 }
  0x59   : > { %856 = vmatpush3.msra.mxu0 %v506_v41 }
  0x5a   : > { %857 = vmatprep.subr.mxu0 %v505_v42 }
  0x5b   : > { %858 = vmatpush3.msra.mxu0 %v505_v42 }
  0xfb   : > { %v791_v33 = vpop.f32.mrf.mxu0 }
  0xfc   : > { %v400_v34 = vadd.f32 %v791_v33, %v734_v32 }
  0xfd   : > { %v394_v35 = vpop.f32.mrf.mxu0 }
  0xfe   : > { %v395_v36 = vadd.f32 %v734_v32, %v394_v35  ;;  %v404_v38 = vmax.f32 %v400_v34, 0.0 }
 0x100   : > { %v403_v37 = vmax.f32 %v395_v36, 0.0 }
 0x102   : > { %824 = vmatprep.mubr.f32.mxu1 %v403_v37 }
 0x103   : > { %825 = vmatmul.mubr.f32.vlgmr.msra.gmra.mxu1 %v404_v38 }
 0x1c3   : > { %v826_v44 = vpop.f32.mrf.mxu1 }
 0x1c4   : > { %v500_v45 = vadd.f32 %v826_v44, %v737_v43 }
 0x1c5   : > { %v494_v46 = vpop.f32.mrf.mxu1 }
 0x1c6   : > { %v495_v47 = vadd.f32 %v737_v43, %v494_v46  ;;  %v504_v49 = vmax.f32 %v500_v45, 0.0 }
 0x1c8   : > { %v503_v48 = vmax.f32 %v495_v47, 0.0 }
 0x1ca   : > { %859 = vmatprep.mubr.f32.mxu0 %v503_v48 }
 0x1cb   : > { %860 = vmatmul.mubr.f32.vlgmr.msra.gmra.mxu0 %v504_v49 }
 0x28b   : > { %v861_v50 = vpop.f32.mrf.mxu0 }
 0x28c   : > { %v600_v54 = vadd.f32 %v861_v50, %v738_v51 }
 0x28d   : > { %v594_v52 = vpop.f32.mrf.mxu0 }
 0x28e   : > { %v595_v53 = vadd.f32 %v738_v51, %v594_v52 }
 0x290   : > { %603 = vmax.xlane.f32.xlu0 %v595_v53 }
 0x294   : > { %605 = vmax.xlane.f32.xlu0 %v600_v54 }
 0x319   : > { %v604_v55 = vpop.xlane.xlu0 %603 }
 0x31a   : > { %v607_v56 = vsub.f32 %v595_v53, %v604_v55 }
 0x31c   : > { %v609_v57 = vmul.f32 1.442695, %v607_v56 }
 0x31d   : > { %v606_v58 = vpop.xlane.xlu0 %605 }
 0x31e   : > { %v608_v59 = vsub.f32 %v600_v54, %v606_v58  ;;  %926 = vpow2.f32 %v609_v57 }
 0x320   : > { %v611_v60 = vmul.f32 1.442695, %v608_v59 }
 0x322   : > { %928 = vpow2.f32 %v611_v60 }
 0x32b   : > { %v927_v61 = vpop.eup %926 }
 0x32c   : > { %613 = vadd.xlane.f32.xlu1 %v927_v61 }
 0x32f   : > { %v929_v62 = vpop.eup %928 }
 0x330   : > { %615 = vadd.xlane.f32.xlu1 %v929_v62 }
 0x3b5   : > { %v614_v63 = vpop.xlane.xlu1 %613 }
 0x3b6   : > { %930 = vlog2.f32 %v614_v63 }
 0x3b9   : > { %v616_v0 = vpop.xlane.xlu1 %615 }
 0x3ba   : > { %932 = vlog2.f32 %v616_v0 }
 0x3c3   : > { %v931_v1 = vpop.eup %930 }
 0x3c4   : > { %v618_v2 = vmul.f32 0.6931472, %v931_v1 }
 0x3c6   : > { %v621_v3 = vsub.f32 %v607_v56, %v618_v2 }
 0x3c7   : > { %v933_v4 = vpop.eup %932 }
 0x3c8   : > { %623 = vst [vmem:[%s302_s16] sm:$0xff] %v621_v3  ;;  %v620_v5 = vmul.f32 0.6931472, %v933_v4 }
 0x3ca   : > { %v622_v6 = vsub.f32 %v608_v59, %v620_v5 }
 0x3cc   : > { %624 = vst [vmem:[%s302_s16 + $0x8] sm:$0xff] %v622_v6 }
 0x3cd   : > { %999 = shalt.err (!%p996_p3)
}
 0x3ce   : > { %s1000_s9 = scalar_lea.hbm %s1220_s21, 256  ;;  %s1004_s13 = scalar_lea.hbm %s1269_s7, 1024 }
 0x3cf   : > { %p1001_p2 = scmp.ne.s32.totalorder %s1220_s21, %s1000_s9  ;;  %p1005_p7 = scmp.lt.s32.totalorder %s1220_s21, %s1269_s7 }
 0x3d0   : > { %p1006_p6 = scmp.lt.s32.totalorder %s1004_s13, %s1000_s9 }
 0x3d1   : > { %p1002_p4 = pnand %p1001_p2, %p1141_p5 }
 0x3d2   : > { %p1007_p9 = por %p1006_p6, %p1005_p7 }
 0x3d3   : > { %p1003_p13 = pneg %p1002_p4 }
 0x3d5   : > { %p1008_p10 = pnand %p1007_p9, %p1003_p13 }
 0x3d7   : > { %1011 = shalt.err (!%p1008_p10)
}
 0x3d8   : > { %s1061_s19 = smov 128   ;;  %s1062_s20 = smov 8  }
 0x3d9   : > { %870 = dma.vmem_to_hbm [thread:$0]  (%p1141_p5), %s1215_s17, 256, %s1220_s21, %s1222_s22, %s1061_s19, %s1061_s19, %s1062_s20  }
 0x3da PF: > { %p887_p12 = scmp.ge.s32.totalorder %s1054_s27, 2  ;;  %s654_s23 = sand.u32 1, %s1042_s24  }
 0x3db   : > { %p1279_p8 = scmp.ne.s32.totalorder %s1272_s12, 0  ;;  %s655_s28 = scalar_lea.sflag [#allocation4], %s654_s23 }
 0x3dd   : > { %p880_p11 = pnand %p887_p12, %p1279_p8 }
 0x3df   : > { %p881_p0 = pneg %p880_p11 }
 0x3e1   : > { %1037 = dma.done.wait (%p881_p0), %s655_s28, 256  }
 0x3e2   : > { %1039 = vsyncadd (%p881_p0), %s655_s28, 4294967040  ;;  %p19_p1 = scmp.ge.s32.totalorder %s1128_s30, 6   ;;  %s1280_s24 = smov %s1046_s25 }
 0x3e3   : > { %s1281_s25 = smov %s1050_s26  ;;  %s1282_s26 = smov %s1139_s10 }
 0x3e4   : > { %s1283_s27 = smov %s1128_s30  ;;  %21 = sbr.rel (!%p19_p1) target bundleno = 5 (0x5), region = 92 }
 0x3e9   :  { %660 = vsyncpa [#allocation3], 1 }
 0x3ea   :  { %662 = vsyncpa [#allocation3 + $0x1], 1 }
 0x3eb   :  { %663 = vsyncpa [#allocation6], 1 }
 0x3ec   :  { %664 = vsyncpa [#allocation4], 1 }
 0x3ed   :  { %666 = vsyncpa [#allocation4 + $0x1], 1 }

// kernel: tpu_custom_call.1
= control target key start
LH: loop header
LB: loop body
LE: loop exit
PB: predicated region body
PF: predicated region fallthrough
CT: control target
= control target key end

     0   :  { %12 = vsyncpa [#allocation3], 0  ;;  %s1262_s0 = inlined_call_operand.vmem [shape: f32[64,16], index: 0, kind: input, shape index: {}]   ;;  %s1263_s1 = inlined_call_operand.vmem [shape: f32[16,128], index: 1, kind: input, shape index: {}]   ;;  %s1264_s2 = inlined_call_operand.vmem [shape: f32[1,128], index: 2, kind: input, shape index: {}]   ;;  %s1265_s3 = inlined_call_operand.hbm [shape: f32[128,128], index: 3, kind: input, shape index: {}]   ;;  %s1266_s4 = inlined_call_operand.vmem [shape: f32[1,128], index: 4, kind: input, shape index: {}]   ;;  %s1267_s5 = inlined_call_operand.hbm [shape: f32[128,128], index: 5, kind: input, shape index: {}]   ;;  %s1268_s6 = inlined_call_operand.vmem [shape: f32[1,128], index: 6, kind: input, shape index: {}]   ;;  %s1269_s7 = inlined_call_operand.hbm [shape: f32[64,128], index: 7, kind: output, shape index: {}]  }
   0x1   :  { %13 = vsyncpa [#allocation6], 0 }
   0x2   :  { %14 = vsyncpa [#allocation4], 0 }
   0x3   :  { %16 = vsyncpa [#allocation4 + $0x1], 0  ;;  %s1103_s24 = smov 0   ;;  %s1105_s25 = smov 0  }
   0x4   :  { %s1107_s26 = smov 0   ;;  %s1109_s27 = smov 0  }
   0x5 LB: > { %s1124_s28 = sadd.s32 4294967295, %s1054_s27   ;;  %s723_s29 = sadd.s32 4294967294, %s1054_s27   ;;  %s1054_s27 = sphi %s1109_s27, %s1283_s27   ;;  %s1050_s26 = sphi %s1107_s26, %s1282_s26   ;;  %s1046_s25 = sphi %s1105_s25, %s1281_s25   ;;  %s1042_s24 = sphi %s1103_s24, %s1280_s24  }
   0x6   : > { %s1128_s30 = sadd.s32 1, %s1054_s27   ;;  %s181_s8 = sadd.s32 1, %s1050_s26 }
   0x7   : > { %s178_s9 = ssub.s32 %s1054_s27, %s1128_s30  ;;  %p191_p0 = scmp.ne.s32.totalorder %s1050_s26, %s1046_s25 }
   0x8   : > { %p179_p1 = scmp.eq.s32.totalorder %s178_s9, 0  ;;  %p192_p2 = scmp.eq.s32.totalorder %s1124_s28, 3 }
   0x9   : > { %p197_p3 = scmp.ne.s32.totalorder %s1046_s25, %s1042_s24  ;;  %p198_p4 = scmp.eq.s32.totalorder %s723_s29, 3 }
   0xa   : > { %s1139_s10 = scalar_select %p179_p1, %s1050_s26, %s181_s8  }
   0xb   : > { %p1141_p5 = por %p192_p2, %p191_p0  ;;  %p1145_p6 = por %p198_p4, %p197_p3 }
   0xc   : > { %p724_p7 = scmp.ge.s32.totalorder %s1054_s27, 1  ;;  %p205_p8 = scmp.lt.s32.totalorder %s1054_s27, 5 }
   0xd   : > { %s1272_s12 = scalar_select %p1145_p6, 1, 0 }
   0xe   : > { %p1270_p9 = scmp.eq.s32.totalorder %s1124_s28, 0  ;;  %p1152_p10 = pnand %p724_p7, %p205_p8 }
   0xf   : > { %s1056_s14 = smov [#allocation2]   ;;  %s1057_s17 = smov [#allocation5]  }
  0x10   : > { %s223_s15 = sshll.u32 %s1056_s14, 4  ;;  %p872_p11 = pneg %p1152_p10  ;;  %s224_s15 = int_to_ptr.vmem [resolvable:$true] %s223_s15 }
  0x11   : > { %s239_s18 = sshll.u32 %s1057_s17, 4  ;;  %s945_s19 = scalar_lea.vmem %s224_s15, 2048  ;;  %s240_s18 = int_to_ptr.vmem [resolvable:$true] %s239_s18 }
  0x12   : > { %p1160_p12 = pnand %p1270_p9, %p872_p11  ;;  %p946_p0 = scmp.ne.s32.totalorder %s224_s15, %s945_s19 }
  0x13   : > { %p953_p3 = scmp.lt.s32.totalorder %s224_s15, %s224_s15  ;;  %p954_p4 = scmp.lt.s32.totalorder %s945_s19, %s945_s19 }
  0x14   : > { %p936_p13 = pneg %p1160_p12 }
  0x15   : > { %p955_p7 = por %p954_p4, %p953_p3 }
  0x16   : > { %p948_p1 = pnand %p946_p0, %p936_p13 }
  0x18   : > { %p949_p2 = pneg %p948_p1 }
  0x1a   : > { %p956_p8 = pnand %p955_p7, %p949_p2 }
  0x1c   : > { %959 = shalt.err (!%p956_p8)
}
  0x1d   : > { %s1058_s20 = smov 128   ;;  %s1059_s21 = smov 8  }
  0x1e   : > { %875 = dma.hbm_to_vmem [thread:$0]  (!%p1160_p12), %s1265_s3, 2048, %s224_s15, [#allocation3], %s1058_s20, %s1058_s20, %s1059_s21  }
  0x1f   : > { %s971_s29 = scalar_lea.vmem %s240_s18, 2048  ;;  %p979_p9 = scmp.lt.s32.totalorder %s240_s18, %s240_s18 }
  0x20   : > { %p972_p11 = scmp.ne.s32.totalorder %s240_s18, %s971_s29  ;;  %p980_p6 = scmp.lt.s32.totalorder %s971_s29, %s971_s29 }
  0x22   : > { %p974_p0 = pnand %p972_p11, %p936_p13  ;;  %p981_p3 = por %p980_p6, %p979_p9 }
  0x24   : > { %p975_p1 = pneg %p974_p0 }
  0x26   : > { %p982_p2 = pnand %p981_p3, %p975_p1 }
  0x28   : > { %985 = shalt.err (!%p982_p2)
}
  0x29   : > { %878 = dma.hbm_to_vmem [thread:$0]  (!%p1160_p12), %s1267_s5, 2048, %s240_s18, [#allocation6], %s1058_s20, %s1058_s20, %s1059_s21  }
  0x2a   : > { %267 = sbr.rel (%p1152_p10) target bundleno = 986 (0x3da), region = 48  ;;  %p1275_p4 = scmp.eq.s32.totalorder (!%p1152_p10), %s1124_s28, 0 }
  0x2f   : > { %1029 = dma.done.wait (%p1275_p4), [#allocation3], 2048   ;;  %p1276_p13 = pmov %p1275_p4 }
  0x30   : > { %p1277_p7 = pmov %p1275_p4 }
  0x31   : > { %1031 = vsyncadd (%p1276_p13), [#allocation3], 4294965248 }
  0x32   : > { %1033 = dma.done.wait (%p1277_p7), [#allocation6], 2048   ;;  %p1278_p6 = pmov %p1275_p4 }
  0x33   : > { %s732_s14 = sshll.u32 %s1124_s28, 1  ;;  %vm321_vm0 = vcmask 130048   ;;  %v313_v0 = vld [vmem:[%s1263_s1 + $0x8] sm:$0xff]  ;;  %v312_v1 = vld [vmem:[%s1263_s1] sm:$0xff]  ;;  %v420_v3 = vld [vmem:[#allocation2 + $0x78] sm:$0xff]  ;;  %s744_s18 = sshll.u32 %s1124_s28, 8 }
  0x34   : > { %1035 = vsyncadd (%p1278_p6), [#allocation6], 4294965248  ;;  %p304_p9 = scmp.lt.s32.totalorder %s732_s14, 7  ;;  %785 = vmatprep.subr.mxu0 %v313_v0  ;;  %v419_v4 = vld [vmem:[#allocation2 + $0x70] sm:$0xff]  ;;  %792 = vmatprep.subr.mxu1 %v420_v3  ;;  %v418_v6 = vld [vmem:[#allocation2 + $0x68] sm:$0xff]  ;;  %s1220_s21 = scalar_lea.hbm %s1269_s7, %s744_s18 }
  0x35   : > { %786 = vmatpush3.msra.mxu0 %v313_v0  ;;  %793 = vmatpush3.msra.mxu1 %v420_v3  ;;  %v417_v7 = vld [vmem:[#allocation2 + $0x60] sm:$0xff]  ;;  %v416_v8 = vld [vmem:[#allocation2 + $0x58] sm:$0xff]  ;;  %v415_v9 = vld [vmem:[#allocation2 + $0x50] sm:$0xff]  ;;  %s1060_s28 = smov [#allocation7]  }
  0x36   : > { %s1285_s14 = smov (!%p304_p9, %s732_s14), 7  ;;  %787 = vmatprep.subr.mxu0 %v312_v1  ;;  %794 = vmatprep.subr.mxu1 %v419_v4  ;;  %v414_v10 = vld [vmem:[#allocation2 + $0x48] sm:$0xff]  ;;  %v413_v11 = vld [vmem:[#allocation2 + $0x40] sm:$0xff]  ;;  %v412_v12 = vld [vmem:[#allocation2 + $0x38] sm:$0xff]  ;;  %s990_s29 = sshll.u32 %s1060_s28, 4  ;;  %s991_s29 = int_to_ptr.vmem [resolvable:$false] %s990_s29 }
  0x37   : > { %s733_s15 = sshll.u32 %s1285_s14, 3  ;;  %788 = vmatpush3.msra.mxu0 %v312_v1  ;;  %795 = vmatpush3.msra.mxu1 %v419_v4  ;;  %v411_v13 = vld [vmem:[#allocation2 + $0x30] sm:$0xff]  ;;  %v410_v14 = vld [vmem:[#allocation2 + $0x28] sm:$0xff]  ;;  %v409_v15 = vld [vmem:[#allocation2 + $0x20] sm:$0xff]  ;;  %s992_s8 = scalar_lea.vmem %s991_s29, 512 }
  0x38   : > { %s307_s17 = scalar_lea.vmem %s1262_s0, %s733_s15  ;;  %796 = vmatprep.subr.mxu1 %v418_v6  ;;  %v408_v16 = vld [vmem:[#allocation2 + $0x18] sm:$0xff]  ;;  %v407_v17 = vld [vmem:[#allocation2 + $0x10] sm:$0xff]  ;;  %v406_v18 = vld [vmem:[#allocation2 + $0x8] sm:$0xff]  ;;  %s300_s15 = sand.u32 1, %s1046_s25  }
  0x39   : > { %v310_v2 = vld [vmem:[%s307_s17] sm:$0xff]  ;;  %v311_v5 = vld [vmem:[%s307_s17 + $0x8] sm:$0xff]  ;;  %797 = vmatpush3.msra.mxu1 %v418_v6  ;;  %v520_v20 = vld [vmem:[#allocation5 + $0x78] sm:$0xff]  ;;  %s731_s13 = sshll.u32 %s300_s15, 4  ;;  %s1222_s22 = scalar_lea.sflag [#allocation4], %s300_s15 }
  0x3a   : > { %789 = vmatprep.mubr.msk.f32.mxu0 %vm321_vm0, %v310_v2  ;;  %798 = vmatprep.subr.mxu1 %v417_v7  ;;  %v405_v19 = vld [vmem:[#allocation2] sm:$0xff]  ;;  %v519_v21 = vld [vmem:[#allocation5 + $0x70] sm:$0xff]  ;;  %v518_v22 = vld [vmem:[#allocation5 + $0x68] sm:$0xff]  ;;  %s302_s16 = scalar_lea.vmem [#allocation7], %s731_s13 }
  0x3b   : > { %790 = vmatmul.mubr.msk.f32.vlgmr.msra.gmra.mxu0 %vm321_vm0, %v311_v5  ;;  %799 = vmatpush3.msra.mxu1 %v417_v7  ;;  %v517_v23 = vld [vmem:[#allocation5 + $0x60] sm:$0xff]  ;;  %v516_v24 = vld [vmem:[#allocation5 + $0x58] sm:$0xff]  ;;  %v515_v25 = vld [vmem:[#allocation5 + $0x50] sm:$0xff]  ;;  %s639_s17 = sshll.u32 %s302_s16, 4  ;;  %s1215_s17 = int_to_ptr.vmem [resolvable:$true] %s639_s17 }
  0x3c   : > { %800 = vmatprep.subr.mxu1 %v416_v8  ;;  %827 = vmatprep.subr.mxu0 %v520_v20  ;;  %v514_v26 = vld [vmem:[#allocation5 + $0x48] sm:$0xff]  ;;  %v513_v27 = vld [vmem:[#allocation5 + $0x40] sm:$0xff]  ;;  %v512_v28 = vld [vmem:[#allocation5 + $0x38] sm:$0xff]  ;;  %s986_s23 = scalar_lea.vmem %s1215_s17, 256  ;;  %p993_p11 = scmp.lt.s32.totalorder %s1215_s17, %s991_s29 }
  0x3d   : > { %801 = vmatpush3.msra.mxu1 %v416_v8  ;;  %828 = vmatpush3.msra.mxu0 %v520_v20  ;;  %v511_v29 = vld [vmem:[#allocation5 + $0x30] sm:$0xff]  ;;  %v510_v30 = vld [vmem:[#allocation5 + $0x28] sm:$0xff]  ;;  %v509_v31 = vld [vmem:[#allocation5 + $0x20] sm:$0xff]  ;;  %p987_p10 = scmp.ne.s32.totalorder %s1215_s17, %s986_s23  ;;  %p994_p0 = scmp.lt.s32.totalorder %s992_s8, %s986_s23 }
  0x3e   : > { %802 = vmatprep.subr.mxu1 %v415_v9  ;;  %829 = vmatprep.subr.mxu0 %v519_v21  ;;  %v734_v32 = vld [vmem:[%s1264_s2] ss:$0 sm:$0xff]  ;;  %v508_v39 = vld [vmem:[#allocation5 + $0x18] sm:$0xff]  ;;  %v507_v40 = vld [vmem:[#allocation5 + $0x10] sm:$0xff] }
  0x3f   : > { %803 = vmatpush3.msra.mxu1 %v415_v9  ;;  %830 = vmatpush3.msra.mxu0 %v519_v21  ;;  %v506_v41 = vld [vmem:[#allocation5 + $0x8] sm:$0xff]  ;;  %v505_v42 = vld [vmem:[#allocation5] sm:$0xff]  ;;  %p988_p12 = pnand %p987_p10, %p1141_p5  ;;  %p995_p1 = por %p994_p0, %p993_p11 }
  0x40   : > { %804 = vmatprep.subr.mxu1 %v414_v10  ;;  %831 = vmatprep.subr.mxu0 %v518_v22  ;;  %v737_v43 = vld [vmem:[%s1266_s4] ss:$0 sm:$0xff] }
  0x41   : > { %805 = vmatpush3.msra.mxu1 %v414_v10  ;;  %832 = vmatpush3.msra.mxu0 %v518_v22  ;;  %v738_v51 = vld [vmem:[%s1268_s6] ss:$0 sm:$0xff]  ;;  %p989_p8 = pneg %p988_p12 }
  0x42   : > { %806 = vmatprep.subr.mxu1 %v413_v11  ;;  %833 = vmatprep.subr.mxu0 %v517_v23 }
  0x43   : > { %807 = vmatpush3.msra.mxu1 %v413_v11  ;;  %834 = vmatpush3.msra.mxu0 %v517_v23  ;;  %p996_p3 = pnand %p995_p1, %p989_p8 }
  0x44   : > { %808 = vmatprep.subr.mxu1 %v412_v12  ;;  %835 = vmatprep.subr.mxu0 %v516_v24 }
  0x45   : > { %809 = vmatpush3.msra.mxu1 %v412_v12  ;;  %836 = vmatpush3.msra.mxu0 %v516_v24 }
  0x46   : > { %810 = vmatprep.subr.mxu1 %v411_v13  ;;  %837 = vmatprep.subr.mxu0 %v515_v25 }
  0x47   : > { %811 = vmatpush3.msra.mxu1 %v411_v13  ;;  %838 = vmatpush3.msra.mxu0 %v515_v25 }
  0x48   : > { %812 = vmatprep.subr.mxu1 %v410_v14  ;;  %839 = vmatprep.subr.mxu0 %v514_v26 }
  0x49   : > { %813 = vmatpush3.msra.mxu1 %v410_v14  ;;  %840 = vmatpush3.msra.mxu0 %v514_v26 }
  0x4a   : > { %814 = vmatprep.subr.mxu1 %v409_v15  ;;  %841 = vmatprep.subr.mxu0 %v513_v27 }
  0x4b   : > { %815 = vmatpush3.msra.mxu1 %v409_v15  ;;  %842 = vmatpush3.msra.mxu0 %v513_v27 }
  0x4c   : > { %816 = vmatprep.subr.mxu1 %v408_v16  ;;  %843 = vmatprep.subr.mxu0 %v512_v28 }
  0x4d   : > { %817 = vmatpush3.msra.mxu1 %v408_v16  ;;  %844 = vmatpush3.msra.mxu0 %v512_v28 }
  0x4e   : > { %818 = vmatprep.subr.mxu1 %v407_v17  ;;  %845 = vmatprep.subr.mxu0 %v511_v29 }
  0x4f   : > { %819 = vmatpush3.msra.mxu1 %v407_v17  ;;  %846 = vmatpush3.msra.mxu0 %v511_v29 }
  0x50   : > { %820 = vmatprep.subr.mxu1 %v406_v18  ;;  %847 = vmatprep.subr.mxu0 %v510_v30 }
  0x51   : > { %821 = vmatpush3.msra.mxu1 %v406_v18  ;;  %848 = vmatpush3.msra.mxu0 %v510_v30 }
  0x52   : > { %822 = vmatprep.subr.mxu1 %v405_v19  ;;  %849 = vmatprep.subr.mxu0 %v509_v31 }
  0x53   : > { %823 = vmatpush3.msra.mxu1 %v405_v19  ;;  %850 = vmatpush3.msra.mxu0 %v509_v31 }
  0x54   : > { %851 = vmatprep.subr.mxu0 %v508_v39 }
  0x55   : > { %852 = vmatpush3.msra.mxu0 %v508_v39 }
  0x56   : > { %853 = vmatprep.subr.mxu0 %v507_v40 }
  0x57   : > { %854 = vmatpush3.msra.mxu0 %v507_v40 }
  0x58   : > { %855 = vmatprep.subr.mxu0 %v506_v41 }
  0x59   : > { %856 = vmatpush3.msra.mxu0 %v506_v41 }
  0x5a   : > { %857 = vmatprep.subr.mxu0 %v505_v42 }
  0x5b   : > { %858 = vmatpush3.msra.mxu0 %v505_v42 }
  0xfb   : > { %v791_v33 = vpop.f32.mrf.mxu0 }
  0xfc   : > { %v400_v34 = vadd.f32 %v791_v33, %v734_v32 }
  0xfd   : > { %v394_v35 = vpop.f32.mrf.mxu0 }
  0xfe   : > { %v395_v36 = vadd.f32 %v734_v32, %v394_v35  ;;  %v404_v38 = vmax.f32 %v400_v34, 0.0 }
 0x100   : > { %v403_v37 = vmax.f32 %v395_v36, 0.0 }
 0x102   : > { %824 = vmatprep.mubr.f32.mxu1 %v403_v37 }
 0x103   : > { %825 = vmatmul.mubr.f32.vlgmr.msra.gmra.mxu1 %v404_v38 }
 0x1c3   : > { %v826_v44 = vpop.f32.mrf.mxu1 }
 0x1c4   : > { %v500_v45 = vadd.f32 %v826_v44, %v737_v43 }
 0x1c5   : > { %v494_v46 = vpop.f32.mrf.mxu1 }
 0x1c6   : > { %v495_v47 = vadd.f32 %v737_v43, %v494_v46  ;;  %v504_v49 = vmax.f32 %v500_v45, 0.0 }
 0x1c8   : > { %v503_v48 = vmax.f32 %v495_v47, 0.0 }
 0x1ca   : > { %859 = vmatprep.mubr.f32.mxu0 %v503_v48 }
 0x1cb   : > { %860 = vmatmul.mubr.f32.vlgmr.msra.gmra.mxu0 %v504_v49 }
 0x28b   : > { %v861_v50 = vpop.f32.mrf.mxu0 }
 0x28c   : > { %v600_v54 = vadd.f32 %v861_v50, %v738_v51 }
 0x28d   : > { %v594_v52 = vpop.f32.mrf.mxu0 }
 0x28e   : > { %v595_v53 = vadd.f32 %v738_v51, %v594_v52 }
 0x290   : > { %603 = vmax.xlane.f32.xlu0 %v595_v53 }
 0x294   : > { %605 = vmax.xlane.f32.xlu0 %v600_v54 }
 0x319   : > { %v604_v55 = vpop.xlane.xlu0 %603 }
 0x31a   : > { %v607_v56 = vsub.f32 %v595_v53, %v604_v55 }
 0x31c   : > { %v609_v57 = vmul.f32 1.442695, %v607_v56 }
 0x31d   : > { %v606_v58 = vpop.xlane.xlu0 %605 }
 0x31e   : > { %v608_v59 = vsub.f32 %v600_v54, %v606_v58  ;;  %926 = vpow2.f32 %v609_v57 }
 0x320   : > { %v611_v60 = vmul.f32 1.442695, %v608_v59 }
 0x322   : > { %928 = vpow2.f32 %v611_v60 }
 0x32b   : > { %v927_v61 = vpop.eup %926 }
 0x32c   : > { %613 = vadd.xlane.f32.xlu1 %v927_v61 }
 0x32f   : > { %v929_v62 = vpop.eup %928 }
 0x330   : > { %615 = vadd.xlane.f32.xlu1 %v929_v62 }
 0x3b5   : > { %v614_v63 = vpop.xlane.xlu1 %613 }
 0x3b6   : > { %930 = vlog2.f32 %v614_v63 }
 0x3b9   : > { %v616_v0 = vpop.xlane.xlu1 %615 }
 0x3ba   : > { %932 = vlog2.f32 %v616_v0 }
 0x3c3   : > { %v931_v1 = vpop.eup %930 }
 0x3c4   : > { %v618_v2 = vmul.f32 0.6931472, %v931_v1 }
 0x3c6   : > { %v621_v3 = vsub.f32 %v607_v56, %v618_v2 }
 0x3c7   : > { %v933_v4 = vpop.eup %932 }
 0x3c8   : > { %623 = vst [vmem:[%s302_s16] sm:$0xff] %v621_v3  ;;  %v620_v5 = vmul.f32 0.6931472, %v933_v4 }
 0x3ca   : > { %v622_v6 = vsub.f32 %v608_v59, %v620_v5 }
 0x3cc   : > { %624 = vst [vmem:[%s302_s16 + $0x8] sm:$0xff] %v622_v6 }
 0x3cd   : > { %999 = shalt.err (!%p996_p3)
}
 0x3ce   : > { %s1000_s9 = scalar_lea.hbm %s1220_s21, 256  ;;  %s1004_s13 = scalar_lea.hbm %s1269_s7, 1024 }
 0x3cf   : > { %p1001_p2 = scmp.ne.s32.totalorder %s1220_s21, %s1000_s9  ;;  %p1005_p7 = scmp.lt.s32.totalorder %s1220_s21, %s1269_s7 }
 0x3d0   : > { %p1006_p6 = scmp.lt.s32.totalorder %s1004_s13, %s1000_s9 }
 0x3d1   : > { %p1002_p4 = pnand %p1001_p2, %p1141_p5 }
 0x3d2   : > { %p1007_p9 = por %p1006_p6, %p1005_p7 }
 0x3d3   : > { %p1003_p13 = pneg %p1002_p4 }
 0x3d5   : > { %p1008_p10 = pnand %p1007_p9, %p1003_p13 }
 0x3d7   : > { %1011 = shalt.err (!%p1008_p10)
}
 0x3d8   : > { %s1061_s19 = smov 128   ;;  %s1062_s20 = smov 8  }
 0x3d9   : > { %870 = dma.vmem_to_hbm [thread:$0]  (%p1141_p5), %s1215_s17, 256, %s1220_s21, %s1222_s22, %s1061_s19, %s1061_s19, %s1062_s20  }
 0x3da PF: > { %p887_p12 = scmp.ge.s32.totalorder %s1054_s27, 2  ;;  %s654_s23 = sand.u32 1, %s1042_s24  }
 0x3db   : > { %p1279_p8 = scmp.ne.s32.totalorder %s1272_s12, 0  ;;  %s655_s28 = scalar_lea.sflag [#allocation4], %s654_s23 }
 0x3dd   : > { %p880_p11 = pnand %p887_p12, %p1279_p8 }
 0x3df   : > { %p881_p0 = pneg %p880_p11 }
 0x3e1   : > { %1037 = dma.done.wait (%p881_p0), %s655_s28, 256  }
 0x3e2   : > { %1039 = vsyncadd (%p881_p0), %s655_s28, 4294967040  ;;  %p19_p1 = scmp.ge.s32.totalorder %s1128_s30, 6   ;;  %s1280_s24 = smov %s1046_s25 }
 0x3e3   : > { %s1281_s25 = smov %s1050_s26  ;;  %s1282_s26 = smov %s1139_s10 }
 0x3e4   : > { %s1283_s27 = smov %s1128_s30  ;;  %21 = sbr.rel (!%p19_p1) target bundleno = 5 (0x5), region = 92 }
 0x3e9   :  { %660 = vsyncpa [#allocation3], 1 }
 0x3ea   :  { %662 = vsyncpa [#allocation3 + $0x1], 1 }
 0x3eb   :  { %663 = vsyncpa [#allocation6], 1 }
 0x3ec   :  { %664 = vsyncpa [#allocation4], 1 }
 0x3ed   :  { %666 = vsyncpa [#allocation4 + $0x1], 1 }

</bundles_post_ra>
